<compile_context>
chip_gen: v7x
topology: tpu7x:2x2x1
jax: 0.10.0
libtpu: 0.0.40
codegen_flags: <defaults>
</compile_context>

<pallas_src>
import functools
import math

import jax
import jax.numpy as jnp
from jax.experimental import pallas as pl
from jax.experimental.pallas import tpu as pltpu


# ---------------------------------------------------------------------------
# small helpers
# ---------------------------------------------------------------------------

def _round_up(n, m):
    return ((n + m - 1) // m) * m


def _pad_rows(x, axis, target):
    n = x.shape[axis]
    if n == target:
        return x
    widths = [(0, 0)] * x.ndim
    widths[axis] = (0, target - n)
    return jnp.pad(x, widths)


def _vmem_limit_bytes(estimate):
    """Generation-aware VMEM limit: enough for the footprint, <= 3/4 of capacity."""
    try:
        cap = pltpu.get_tpu_info().vmem_capacity_bytes
    except Exception:
        cap = 64 * 1024 * 1024          # v7x per-TC budget (smallest across gens)
    return int(min(max(2 * int(estimate), 32 * 1024 * 1024), cap * 3 // 4))


def _probe_copy_kernel(x_ref, o_ref):
    o_ref[...] = x_ref[...]


@functools.cache
def _single_buffer_supported():
    """Probe whether this JAX build honors pipeline_mode=pl.Buffered(1) in pallas_call."""
    try:
        spec = pl.BlockSpec((8, 128), lambda i: (0, 0), pipeline_mode=pl.Buffered(1))
        fn = pl.pallas_call(
            _probe_copy_kernel,
            out_shape=jax.ShapeDtypeStruct((8, 128), jnp.float32),
            grid=(1,),
            in_specs=[spec],
            out_specs=pl.BlockSpec((8, 128), lambda i: (0, 0)),
        )
        jax.block_until_ready(fn(jnp.zeros((8, 128), jnp.float32)))
        return True
    except Exception:
        return False


def _resident_spec(shape):
    """BlockSpec for an operand that is identical on every grid step (weights/biases).

    The block never changes, so double-buffering it would only double its VMEM
    footprint -> request a single buffer when supported."""
    n = len(shape)
    index_map = lambda *_: (0,) * n
    if _single_buffer_supported():
        return pl.BlockSpec(shape, index_map, pipeline_mode=pl.Buffered(1))
    return pl.BlockSpec(shape, index_map)


# ---------------------------------------------------------------------------
# kernel 1: Q/K/V input projections (each sequence row projected exactly once)
# ---------------------------------------------------------------------------

def _qkv_projection_kernel(xq_ref, xk_ref, xv_ref,
                           wq_ref, bq_ref, wk_ref, bk_ref, wv_ref, bv_ref,
                           q_ref, k_ref, v_ref, *, h, d_k):
    """x*_ref: [tile, d_model] bf16.  w*_ref: [d_model, d_model] bf16 (pre-transposed,
    1/sqrt(d_k) folded into wq).  b*_ref: [1, d_model] f32.
    q/k/v_ref: [h, tile, d_k] bf16 (head-split outputs)."""

    def project(x_ref, w_ref, b_ref, o_ref):
        # Full-width matmul (K = N = d_model) keeps the MXU filled — one matmul
        # instead of h matmuls with N=d_k.
        y = jnp.dot(x_ref[...], w_ref[...], preferred_element_type=jnp.float32)
        y = y + b_ref[...]
        for head in range(h):                    # static head split via lane slices
            o_ref[head] = y[:, head * d_k:(head + 1) * d_k].astype(o_ref.dtype)

    project(xq_ref, wq_ref, bq_ref, q_ref)
    project(xk_ref, wk_ref, bk_ref, k_ref)
    project(xv_ref, wv_ref, bv_ref, v_ref)


# ---------------------------------------------------------------------------
# kernel 2: flash attention (online softmax over key tiles) + output projection
# ---------------------------------------------------------------------------

def _flash_attention_kernel(q_ref, k_ref, v_ref, wo_ref, bo_ref, out_ref,
                            m_sc, l_sc, acc_sc, merged_sc, *, s_valid, mask_keys):
    """q_ref: [h, tq, d_k] (scale folded into Wq).  k/v_ref: [h, tk, d_k] streamed per
    key tile.  wo_ref: [d_model, d_model], bo_ref: [1, d_model].  out_ref: [tq, d_model].
    Scratch: m/l [h, tq, 1] f32, acc [h, tq, d_k] f32, merged [tq, d_model] bf16."""
    ki = pl.program_id(1)

    @pl.when(ki == 0)
    def _init():
        m_sc[...] = jnp.full(m_sc.shape, -jnp.inf, m_sc.dtype)
        l_sc[...] = jnp.zeros(l_sc.shape, l_sc.dtype)
        acc_sc[...] = jnp.zeros(acc_sc.shape, acc_sc.dtype)

    q = q_ref[...]                       # [h, tq, d_k]
    k = k_ref[...]                       # [h, tk, d_k]
    v = v_ref[...]

    # Scores; contraction over the last dims -> no K^T materialized.
    s = jnp.einsum("hqd,hkd->hqk", q, k, preferred_element_type=jnp.float32)
    if mask_keys:                        # static: sequence was padded to a tile multiple
        tk = k.shape[1]
        pos = ki * tk + jax.lax.broadcasted_iota(jnp.int32, s.shape, 2)
        s = jnp.where(pos < s_valid, s, -1e30)

    # Online softmax update (f32 stats, bf16 MXU operands).
    m_prev = m_sc[...]
    m_new = jnp.maximum(m_prev, jnp.max(s, axis=-1, keepdims=True))
    alpha = jnp.exp(m_prev - m_new)
    p = jnp.exp(s - m_new)
    l_sc[...] = alpha * l_sc[...] + jnp.sum(p, axis=-1, keepdims=True)
    acc_sc[...] = alpha * acc_sc[...] + jnp.einsum(
        "hqk,hkd->hqd", p.astype(v.dtype), v, preferred_element_type=jnp.float32)
    m_sc[...] = m_new

    @pl.when(ki == pl.num_programs(1) - 1)
    def _finalize():
        # Normalize with an EUP approximate reciprocal, merge heads via static lane
        # slices into a [tq, d_model] scratch, then ONE K=d_model output matmul.
        ctx = acc_sc[...] * pl.reciprocal(l_sc[...], approx=True)
        ctx = ctx.astype(merged_sc.dtype)                 # [h, tq, d_k]
        n_heads, _, dk = ctx.shape
        for head in range(n_heads):
            merged_sc[:, head * dk:(head + 1) * dk] = ctx[head]
        out = jnp.dot(merged_sc[...], wo_ref[...], preferred_element_type=jnp.float32)
        out_ref[...] = (out + bo_ref[...]).astype(out_ref.dtype)


# ---------------------------------------------------------------------------
# wrapper
# ---------------------------------------------------------------------------

def multi_headed_attention(query, key, value, params, *, h, compute_dtype=jnp.bfloat16):
    """query/key/value: [S, d_model]. Returns [1, S, d_model] (nbatches=1 as in ref)."""
    S, d_model = query.shape
    assert d_model % h == 0
    d_k = d_model // h
    scale = 1.0 / math.sqrt(d_k)

    # One row-tile size shared by the projection grid, query tiles and key tiles.
    tile = min(256, _round_up(S, 8))
    s_pad = _round_up(S, tile)
    n_tiles = s_pad // tile
    mask_keys = s_pad != S

    # Host-side (free) weight prep: transpose to [in, out], fold 1/sqrt(d_k) into Wq/bq.
    wq = (params["wq"].T * scale).astype(compute_dtype)
    wk = params["wk"].T.astype(compute_dtype)
    wv = params["wv"].T.astype(compute_dtype)
    wo = params["wo"].T.astype(compute_dtype)
    bq = (params["bq"] * scale).reshape(1, d_model).astype(jnp.float32)
    bk = params["bk"].reshape(1, d_model).astype(jnp.float32)
    bv = params["bv"].reshape(1, d_model).astype(jnp.float32)
    bo = params["bo"].reshape(1, d_model).astype(jnp.float32)

    xq = _pad_rows(query.astype(compute_dtype), 0, s_pad)
    xk = _pad_rows(key.astype(compute_dtype), 0, s_pad)
    xv = _pad_rows(value.astype(compute_dtype), 0, s_pad)

    # ---- kernel 1: Q/K/V projections (K/V computed exactly once, not per q-tile) ----
    proj_est = (3 * d_model * d_model * 2 + 3 * 8 * d_model * 4        # resident W, b
                + 2 * 6 * tile * d_model * 2                           # pipelined tiles
                + (2 << 20))
    q, k, v = pl.pallas_call(
        functools.partial(_qkv_projection_kernel, h=h, d_k=d_k),
        out_shape=(jax.ShapeDtypeStruct((h, s_pad, d_k), compute_dtype),) * 3,
        grid=(n_tiles,),
        in_specs=[
            pl.BlockSpec((tile, d_model), lambda i: (i, 0)),
            pl.BlockSpec((tile, d_model), lambda i: (i, 0)),
            pl.BlockSpec((tile, d_model), lambda i: (i, 0)),
            _resident_spec((d_model, d_model)), _resident_spec((1, d_model)),   # Wq, bq
            _resident_spec((d_model, d_model)), _resident_spec((1, d_model)),   # Wk, bk
            _resident_spec((d_model, d_model)), _resident_spec((1, d_model)),   # Wv, bv
        ],
        out_specs=(
            pl.BlockSpec((h, tile, d_k), lambda i: (0, i, 0)),
            pl.BlockSpec((h, tile, d_k), lambda i: (0, i, 0)),
            pl.BlockSpec((h, tile, d_k), lambda i: (0, i, 0)),
        ),
        compiler_params=pltpu.CompilerParams(
            dimension_semantics=("parallel",),
            vmem_limit_bytes=_vmem_limit_bytes(proj_est)),
    )(xq, xk, xv, wq, bq, wk, bk, wv, bv)

    # ---- kernel 2: flash attention + output projection ----
    attn_est = (d_model * d_model * 2 + 8 * d_model * 4                # resident Wo, bo
                + 2 * 3 * tile * d_model * 2                           # q/k/v tiles
                + 2 * tile * d_model * 4                               # out tile
                + h * tile * (d_k + 2 * 128) * 4                       # acc + m + l
                + tile * d_model * 2                                   # merged scratch
                + 2 * h * tile * tile * 4                              # scores/probs
                + (2 << 20))
    out = pl.pallas_call(
        functools.partial(_flash_attention_kernel, s_valid=S, mask_keys=mask_keys),
        out_shape=jax.ShapeDtypeStruct((s_pad, d_model), query.dtype),
        grid=(n_tiles, n_tiles),
        in_specs=[
            pl.BlockSpec((h, tile, d_k), lambda qi, ki: (0, qi, 0)),   # q tile
            pl.BlockSpec((h, tile, d_k), lambda qi, ki: (0, ki, 0)),   # k tile (streamed)
            pl.BlockSpec((h, tile, d_k), lambda qi, ki: (0, ki, 0)),   # v tile (streamed)
            _resident_spec((d_model, d_model)),                        # Wo
            _resident_spec((1, d_model)),                              # bo
        ],
        out_specs=pl.BlockSpec((tile, d_model), lambda qi, ki: (qi, 0)),
        scratch_shapes=[
            pltpu.VMEM((h, tile, 1), jnp.float32),         # running max m
            pltpu.VMEM((h, tile, 1), jnp.float32),         # running denom l
            pltpu.VMEM((h, tile, d_k), jnp.float32),       # running context acc
            pltpu.VMEM((tile, d_model), compute_dtype),    # merged heads
        ],
        compiler_params=pltpu.CompilerParams(
            dimension_semantics=("parallel", "arbitrary"),
            vmem_limit_bytes=_vmem_limit_bytes(attn_est)),
    )(q, k, v, wo, bo)

    return out[:S][None, :, :]                              # nbatches = 1


# ---------------------------------------------------------------------------
# params / reference / test
# ---------------------------------------------------------------------------

def init_params(key, d_model):
    """Deterministic nn.Linear-style init: U(-1/sqrt(in), 1/sqrt(in))."""
    bound = 1.0 / math.sqrt(d_model)
    names = ["wq", "bq", "wk", "bk", "wv", "bv", "wo", "bo"]
    keys = jax.random.split(key, len(names))
    params = {}
    for name, k in zip(names, keys):
        shape = (d_model, d_model) if name.startswith("w") else (d_model,)
        params[name] = jax.random.uniform(k, shape, jnp.float32, -bound, bound)
    return params


def reference(query, key, value, params, *, h):
    """Pure-JAX f32 reference mirroring the PyTorch forward (mask=None, eval dropout)."""
    S, d_model = query.shape
    d_k = d_model // h

    def lin(x, w, b):
        return x @ w.T + b

    q = lin(query, params["wq"], params["bq"]).reshape(1, S, h, d_k).transpose(0, 2, 1, 3)
    k = lin(key,   params["wk"], params["bk"]).reshape(1, S, h, d_k).transpose(0, 2, 1, 3)
    v = lin(value, params["wv"], params["bv"]).reshape(1, S, h, d_k).transpose(0, 2, 1, 3)

    scores = jnp.einsum("bhqd,bhkd->bhqk", q, k) / math.sqrt(d_k)
    p = jax.nn.softmax(scores, axis=-1)
    x = jnp.einsum("bhqk,bhkd->bhqd", p, v)
    x = x.transpose(0, 2, 1, 3).reshape(1, S, d_model)
    return lin(x, params["wo"], params["bo"])


if __name__ == "__main__":
    S = 8          # sequence length
    d_model = 32   # hidden size
    h = 4          # number of heads (d_k = 8)

    root = jax.random.PRNGKey(0)
    kq, kk, kv, kp = jax.random.split(root, 4)
    query = jax.random.normal(kq, (S, d_model), jnp.float32)
    key_x = jax.random.normal(kk, (S, d_model), jnp.float32)
    value = jax.random.normal(kv, (S, d_model), jnp.float32)
    params = init_params(kp, d_model)

    out = multi_headed_attention(query, key_x, value, params, h=h)
    out = jax.block_until_ready(out)

    ref = reference(query, key_x, value, params, h=h)
    assert out.shape == (1, S, d_model)
    # bf16 MXU operands + approx reciprocal -> compare with loosened tolerance.
    assert jnp.allclose(out, ref, atol=5e-2, rtol=5e-2), "mismatch vs JAX reference"

    print("KERNEL_OK")
</pallas_src>

<mosaic_0001>
module attributes {stable_mosaic.version = 11 : i64} {
  func.func @_probe_copy_kernel(%arg0: i32, %arg1: memref<8x128xf32, #tpu.memory_space<vmem>>, %arg2: memref<8x128xf32, #tpu.memory_space<vmem>>) attributes {dimension_semantics = [#tpu.dimension_semantics<arbitrary>], iteration_bounds = array<i64: 1>, scalar_prefetch = 0 : i64, scratch_operands = 0 : i64, tpu.core_type = #tpu.core_type<tc>, window_params = [{pipeline_mode = #tpu.pipeline_mode<synchronous>, transform_indices = @transform_0, window_bounds = array<i64: 8, 128>}, {pipeline_mode = #tpu.pipeline_mode<synchronous>, transform_indices = @transform_1, window_bounds = array<i64: 8, 128>}]} {
    %c0 = arith.constant 0 : index
    %c0_0 = arith.constant 0 : index
    %0 = vector.load %arg1[%c0, %c0_0] : memref<8x128xf32, #tpu.memory_space<vmem>>, vector<8x128xf32>
    %c0_1 = arith.constant 0 : index
    %c0_2 = arith.constant 0 : index
    %1 = vector.load %arg2[%c0_1, %c0_2] : memref<8x128xf32, #tpu.memory_space<vmem>>, vector<8x128xf32>
    tpu.vector_store %arg2[%c0_1, %c0_2], %0 {strides = array<i32>} : memref<8x128xf32, #tpu.memory_space<vmem>>, vector<8x128xf32>,
    return
  }
  func.func @transform_0(%arg0: i32) -> (i32, i32) {
    %c0_i32 = arith.constant 0 : i32
    %c0_i32_0 = arith.constant 0 : i32
    %c0_i32_1 = arith.constant 0 : i32
    return %c0_i32, %c0_i32_0 : i32, i32
  }
  func.func @transform_1(%arg0: i32) -> (i32, i32) {
    %c0_i32 = arith.constant 0 : i32
    %c0_i32_0 = arith.constant 0 : i32
    %c0_i32_1 = arith.constant 0 : i32
    return %c0_i32, %c0_i32_0 : i32, i32
  }
}

module attributes {stable_mosaic.version = 11 : i64} {
  func.func @_qkv_projection_kernel(%arg0: i32, %arg1: memref<8x32xbf16, #tpu.memory_space<vmem>>, %arg2: memref<8x32xbf16, #tpu.memory_space<vmem>>, %arg3: memref<8x32xbf16, #tpu.memory_space<vmem>>, %arg4: memref<32x32xbf16, #tpu.memory_space<vmem>>, %arg5: memref<1x32xf32, #tpu.memory_space<vmem>>, %arg6: memref<32x32xbf16, #tpu.memory_space<vmem>>, %arg7: memref<1x32xf32, #tpu.memory_space<vmem>>, %arg8: memref<32x32xbf16, #tpu.memory_space<vmem>>, %arg9: memref<1x32xf32, #tpu.memory_space<vmem>>, %arg10: memref<4x8x8xbf16, #tpu.memory_space<vmem>>, %arg11: memref<4x8x8xbf16, #tpu.memory_space<vmem>>, %arg12: memref<4x8x8xbf16, #tpu.memory_space<vmem>>) attributes {dimension_semantics = [#tpu.dimension_semantics<parallel>], iteration_bounds = array<i64: 1>, scalar_prefetch = 0 : i64, scratch_operands = 0 : i64, tpu.core_type = #tpu.core_type<tc>, window_params = [{transform_indices = @transform_0, window_bounds = array<i64: 8, 32>}, {transform_indices = @transform_1, window_bounds = array<i64: 8, 32>}, {transform_indices = @transform_2, window_bounds = array<i64: 8, 32>}, {pipeline_mode = #tpu.pipeline_mode<synchronous>, transform_indices = @transform_3, window_bounds = array<i64: 32, 32>}, {pipeline_mode = #tpu.pipeline_mode<synchronous>, transform_indices = @transform_4, window_bounds = array<i64: 1, 32>}, {pipeline_mode = #tpu.pipeline_mode<synchronous>, transform_indices = @transform_5, window_bounds = array<i64: 32, 32>}, {pipeline_mode = #tpu.pipeline_mode<synchronous>, transform_indices = @transform_6, window_bounds = array<i64: 1, 32>}, {pipeline_mode = #tpu.pipeline_mode<synchronous>, transform_indices = @transform_7, window_bounds = array<i64: 32, 32>}, {pipeline_mode = #tpu.pipeline_mode<synchronous>, transform_indices = @transform_8, window_bounds = array<i64: 1, 32>}, {transform_indices = @transform_9, window_bounds = array<i64: 4, 8, 8>}, {transform_indices = @transform_10, window_bounds = array<i64: 4, 8, 8>}, {transform_indices = @transform_11, window_bounds = array<i64: 4, 8, 8>}]} {
    %c0 = arith.constant 0 : index
    %c0_0 = arith.constant 0 : index
    %0 = vector.load %arg1[%c0, %c0_0] : memref<8x32xbf16, #tpu.memory_space<vmem>>, vector<8x32xbf16>
    %c0_1 = arith.constant 0 : index
    %c0_2 = arith.constant 0 : index
    %1 = vector.load %arg4[%c0_1, %c0_2] : memref<32x32xbf16, #tpu.memory_space<vmem>>, vector<32x32xbf16>
    %cst = arith.constant dense<0.000000e+00> : vector<8x32xf32>
    %2 = tpu.matmul %0, %1, %cst {dimension_numbers = #tpu.dot_dimension_numbers<[1], [0], [0], [1], [0, 0, 1, 1], [], []>} : vector<8x32xbf16>, vector<32x32xbf16>, vector<8x32xf32> -> vector<8x32xf32>
    %c0_3 = arith.constant 0 : index
    %c0_4 = arith.constant 0 : index
    %3 = vector.load %arg5[%c0_3, %c0_4] : memref<1x32xf32, #tpu.memory_space<vmem>>, vector<1x32xf32>
    %4 = vector.broadcast %3 : vector<1x32xf32> to vector<8x32xf32>
    %5 = arith.addf %2, %4 : vector<8x32xf32>
    %6 = vector.extract_strided_slice %5 {offsets = [0, 0], sizes = [8, 8], strides = [1, 1]} : vector<8x32xf32> to vector<8x8xf32>
    %7 = arith.truncf %6 : vector<8x8xf32> to vector<8x8xbf16>
    %c0_5 = arith.constant 0 : index
    %c0_6 = arith.constant 0 : index
    %c0_7 = arith.constant 0 : index
    %8 = vector.load %arg10[%c0_5, %c0_6, %c0_7] : memref<4x8x8xbf16, #tpu.memory_space<vmem>>, vector<1x8x8xbf16>
    %9 = vector.shape_cast %8 : vector<1x8x8xbf16> to vector<8x8xbf16>
    %10 = vector.shape_cast %7 : vector<8x8xbf16> to vector<1x8x8xbf16>
    tpu.vector_store %arg10[%c0_5, %c0_6, %c0_7], %10 {strides = array<i32>} : memref<4x8x8xbf16, #tpu.memory_space<vmem>>, vector<1x8x8xbf16>,
    %11 = vector.extract_strided_slice %5 {offsets = [0, 8], sizes = [8, 8], strides = [1, 1]} : vector<8x32xf32> to vector<8x8xf32>
    %12 = arith.truncf %11 : vector<8x8xf32> to vector<8x8xbf16>
    %c1 = arith.constant 1 : index
    %c0_8 = arith.constant 0 : index
    %c0_9 = arith.constant 0 : index
    %13 = vector.load %arg10[%c1, %c0_8, %c0_9] : memref<4x8x8xbf16, #tpu.memory_space<vmem>>, vector<1x8x8xbf16>
    %14 = vector.shape_cast %13 : vector<1x8x8xbf16> to vector<8x8xbf16>
    %15 = vector.shape_cast %12 : vector<8x8xbf16> to vector<1x8x8xbf16>
    tpu.vector_store %arg10[%c1, %c0_8, %c0_9], %15 {strides = array<i32>} : memref<4x8x8xbf16, #tpu.memory_space<vmem>>, vector<1x8x8xbf16>,
    %16 = vector.extract_strided_slice %5 {offsets = [0, 16], sizes = [8, 8], strides = [1, 1]} : vector<8x32xf32> to vector<8x8xf32>
    %17 = arith.truncf %16 : vector<8x8xf32> to vector<8x8xbf16>
    %c2 = arith.constant 2 : index
    %c0_10 = arith.constant 0 : index
    %c0_11 = arith.constant 0 : index
    %18 = vector.load %arg10[%c2, %c0_10, %c0_11] : memref<4x8x8xbf16, #tpu.memory_space<vmem>>, vector<1x8x8xbf16>
    %19 = vector.shape_cast %18 : vector<1x8x8xbf16> to vector<8x8xbf16>
    %20 = vector.shape_cast %17 : vector<8x8xbf16> to vector<1x8x8xbf16>
    tpu.vector_store %arg10[%c2, %c0_10, %c0_11], %20 {strides = array<i32>} : memref<4x8x8xbf16, #tpu.memory_space<vmem>>, vector<1x8x8xbf16>,
    %21 = vector.extract_strided_slice %5 {offsets = [0, 24], sizes = [8, 8], strides = [1, 1]} : vector<8x32xf32> to vector<8x8xf32>
    %22 = arith.truncf %21 : vector<8x8xf32> to vector<8x8xbf16>
    %c3 = arith.constant 3 : index
    %c0_12 = arith.constant 0 : index
    %c0_13 = arith.constant 0 : index
    %23 = vector.load %arg10[%c3, %c0_12, %c0_13] : memref<4x8x8xbf16, #tpu.memory_space<vmem>>, vector<1x8x8xbf16>
    %24 = vector.shape_cast %23 : vector<1x8x8xbf16> to vector<8x8xbf16>
    %25 = vector.shape_cast %22 : vector<8x8xbf16> to vector<1x8x8xbf16>
    tpu.vector_store %arg10[%c3, %c0_12, %c0_13], %25 {strides = array<i32>} : memref<4x8x8xbf16, #tpu.memory_space<vmem>>, vector<1x8x8xbf16>,
    %c0_14 = arith.constant 0 : index
    %c0_15 = arith.constant 0 : index
    %26 = vector.load %arg2[%c0_14, %c0_15] : memref<8x32xbf16, #tpu.memory_space<vmem>>, vector<8x32xbf16>
    %c0_16 = arith.constant 0 : index
    %c0_17 = arith.constant 0 : index
    %27 = vector.load %arg6[%c0_16, %c0_17] : memref<32x32xbf16, #tpu.memory_space<vmem>>, vector<32x32xbf16>
    %cst_18 = arith.constant dense<0.000000e+00> : vector<8x32xf32>
    %28 = tpu.matmul %26, %27, %cst_18 {dimension_numbers = #tpu.dot_dimension_numbers<[1], [0], [0], [1], [0, 0, 1, 1], [], []>} : vector<8x32xbf16>, vector<32x32xbf16>, vector<8x32xf32> -> vector<8x32xf32>
    %c0_19 = arith.constant 0 : index
    %c0_20 = arith.constant 0 : index
    %29 = vector.load %arg7[%c0_19, %c0_20] : memref<1x32xf32, #tpu.memory_space<vmem>>, vector<1x32xf32>
    %30 = vector.broadcast %29 : vector<1x32xf32> to vector<8x32xf32>
    %31 = arith.addf %28, %30 : vector<8x32xf32>
    %32 = vector.extract_strided_slice %31 {offsets = [0, 0], sizes = [8, 8], strides = [1, 1]} : vector<8x32xf32> to vector<8x8xf32>
    %33 = arith.truncf %32 : vector<8x8xf32> to vector<8x8xbf16>
    %c0_21 = arith.constant 0 : index
    %c0_22 = arith.constant 0 : index
    %c0_23 = arith.constant 0 : index
    %34 = vector.load %arg11[%c0_21, %c0_22, %c0_23] : memref<4x8x8xbf16, #tpu.memory_space<vmem>>, vector<1x8x8xbf16>
    %35 = vector.shape_cast %34 : vector<1x8x8xbf16> to vector<8x8xbf16>
    %36 = vector.shape_cast %33 : vector<8x8xbf16> to vector<1x8x8xbf16>
    tpu.vector_store %arg11[%c0_21, %c0_22, %c0_23], %36 {strides = array<i32>} : memref<4x8x8xbf16, #tpu.memory_space<vmem>>, vector<1x8x8xbf16>,
    %37 = vector.extract_strided_slice %31 {offsets = [0, 8], sizes = [8, 8], strides = [1, 1]} : vector<8x32xf32> to vector<8x8xf32>
    %38 = arith.truncf %37 : vector<8x8xf32> to vector<8x8xbf16>
    %c1_24 = arith.constant 1 : index
    %c0_25 = arith.constant 0 : index
    %c0_26 = arith.constant 0 : index
    %39 = vector.load %arg11[%c1_24, %c0_25, %c0_26] : memref<4x8x8xbf16, #tpu.memory_space<vmem>>, vector<1x8x8xbf16>
    %40 = vector.shape_cast %39 : vector<1x8x8xbf16> to vector<8x8xbf16>
    %41 = vector.shape_cast %38 : vector<8x8xbf16> to vector<1x8x8xbf16>
    tpu.vector_store %arg11[%c1_24, %c0_25, %c0_26], %41 {strides = array<i32>} : memref<4x8x8xbf16, #tpu.memory_space<vmem>>, vector<1x8x8xbf16>,
    %42 = vector.extract_strided_slice %31 {offsets = [0, 16], sizes = [8, 8], strides = [1, 1]} : vector<8x32xf32> to vector<8x8xf32>
    %43 = arith.truncf %42 : vector<8x8xf32> to vector<8x8xbf16>
    %c2_27 = arith.constant 2 : index
    %c0_28 = arith.constant 0 : index
    %c0_29 = arith.constant 0 : index
    %44 = vector.load %arg11[%c2_27, %c0_28, %c0_29] : memref<4x8x8xbf16, #tpu.memory_space<vmem>>, vector<1x8x8xbf16>
    %45 = vector.shape_cast %44 : vector<1x8x8xbf16> to vector<8x8xbf16>
    %46 = vector.shape_cast %43 : vector<8x8xbf16> to vector<1x8x8xbf16>
    tpu.vector_store %arg11[%c2_27, %c0_28, %c0_29], %46 {strides = array<i32>} : memref<4x8x8xbf16, #tpu.memory_space<vmem>>, vector<1x8x8xbf16>,
    %47 = vector.extract_strided_slice %31 {offsets = [0, 24], sizes = [8, 8], strides = [1, 1]} : vector<8x32xf32> to vector<8x8xf32>
    %48 = arith.truncf %47 : vector<8x8xf32> to vector<8x8xbf16>
    %c3_30 = arith.constant 3 : index
    %c0_31 = arith.constant 0 : index
    %c0_32 = arith.constant 0 : index
    %49 = vector.load %arg11[%c3_30, %c0_31, %c0_32] : memref<4x8x8xbf16, #tpu.memory_space<vmem>>, vector<1x8x8xbf16>
    %50 = vector.shape_cast %49 : vector<1x8x8xbf16> to vector<8x8xbf16>
    %51 = vector.shape_cast %48 : vector<8x8xbf16> to vector<1x8x8xbf16>
    tpu.vector_store %arg11[%c3_30, %c0_31, %c0_32], %51 {strides = array<i32>} : memref<4x8x8xbf16, #tpu.memory_space<vmem>>, vector<1x8x8xbf16>,
    %c0_33 = arith.constant 0 : index
    %c0_34 = arith.constant 0 : index
    %52 = vector.load %arg3[%c0_33, %c0_34] : memref<8x32xbf16, #tpu.memory_space<vmem>>, vector<8x32xbf16>
    %c0_35 = arith.constant 0 : index
    %c0_36 = arith.constant 0 : index
    %53 = vector.load %arg8[%c0_35, %c0_36] : memref<32x32xbf16, #tpu.memory_space<vmem>>, vector<32x32xbf16>
    %cst_37 = arith.constant dense<0.000000e+00> : vector<8x32xf32>
    %54 = tpu.matmul %52, %53, %cst_37 {dimension_numbers = #tpu.dot_dimension_numbers<[1], [0], [0], [1], [0, 0, 1, 1], [], []>} : vector<8x32xbf16>, vector<32x32xbf16>, vector<8x32xf32> -> vector<8x32xf32>
    %c0_38 = arith.constant 0 : index
    %c0_39 = arith.constant 0 : index
    %55 = vector.load %arg9[%c0_38, %c0_39] : memref<1x32xf32, #tpu.memory_space<vmem>>, vector<1x32xf32>
    %56 = vector.broadcast %55 : vector<1x32xf32> to vector<8x32xf32>
    %57 = arith.addf %54, %56 : vector<8x32xf32>
    %58 = vector.extract_strided_slice %57 {offsets = [0, 0], sizes = [8, 8], strides = [1, 1]} : vector<8x32xf32> to vector<8x8xf32>
    %59 = arith.truncf %58 : vector<8x8xf32> to vector<8x8xbf16>
    %c0_40 = arith.constant 0 : index
    %c0_41 = arith.constant 0 : index
    %c0_42 = arith.constant 0 : index
    %60 = vector.load %arg12[%c0_40, %c0_41, %c0_42] : memref<4x8x8xbf16, #tpu.memory_space<vmem>>, vector<1x8x8xbf16>
    %61 = vector.shape_cast %60 : vector<1x8x8xbf16> to vector<8x8xbf16>
    %62 = vector.shape_cast %59 : vector<8x8xbf16> to vector<1x8x8xbf16>
    tpu.vector_store %arg12[%c0_40, %c0_41, %c0_42], %62 {strides = array<i32>} : memref<4x8x8xbf16, #tpu.memory_space<vmem>>, vector<1x8x8xbf16>,
    %63 = vector.extract_strided_slice %57 {offsets = [0, 8], sizes = [8, 8], strides = [1, 1]} : vector<8x32xf32> to vector<8x8xf32>
    %64 = arith.truncf %63 : vector<8x8xf32> to vector<8x8xbf16>
    %c1_43 = arith.constant 1 : index
    %c0_44 = arith.constant 0 : index
    %c0_45 = arith.constant 0 : index
    %65 = vector.load %arg12[%c1_43, %c0_44, %c0_45] : memref<4x8x8xbf16, #tpu.memory_space<vmem>>, vector<1x8x8xbf16>
    %66 = vector.shape_cast %65 : vector<1x8x8xbf16> to vector<8x8xbf16>
    %67 = vector.shape_cast %64 : vector<8x8xbf16> to vector<1x8x8xbf16>
    tpu.vector_store %arg12[%c1_43, %c0_44, %c0_45], %67 {strides = array<i32>} : memref<4x8x8xbf16, #tpu.memory_space<vmem>>, vector<1x8x8xbf16>,
    %68 = vector.extract_strided_slice %57 {offsets = [0, 16], sizes = [8, 8], strides = [1, 1]} : vector<8x32xf32> to vector<8x8xf32>
    %69 = arith.truncf %68 : vector<8x8xf32> to vector<8x8xbf16>
    %c2_46 = arith.constant 2 : index
    %c0_47 = arith.constant 0 : index
    %c0_48 = arith.constant 0 : index
    %70 = vector.load %arg12[%c2_46, %c0_47, %c0_48] : memref<4x8x8xbf16, #tpu.memory_space<vmem>>, vector<1x8x8xbf16>
    %71 = vector.shape_cast %70 : vector<1x8x8xbf16> to vector<8x8xbf16>
    %72 = vector.shape_cast %69 : vector<8x8xbf16> to vector<1x8x8xbf16>
    tpu.vector_store %arg12[%c2_46, %c0_47, %c0_48], %72 {strides = array<i32>} : memref<4x8x8xbf16, #tpu.memory_space<vmem>>, vector<1x8x8xbf16>,
    %73 = vector.extract_strided_slice %57 {offsets = [0, 24], sizes = [8, 8], strides = [1, 1]} : vector<8x32xf32> to vector<8x8xf32>
    %74 = arith.truncf %73 : vector<8x8xf32> to vector<8x8xbf16>
    %c3_49 = arith.constant 3 : index
    %c0_50 = arith.constant 0 : index
    %c0_51 = arith.constant 0 : index
    %75 = vector.load %arg12[%c3_49, %c0_50, %c0_51] : memref<4x8x8xbf16, #tpu.memory_space<vmem>>, vector<1x8x8xbf16>
    %76 = vector.shape_cast %75 : vector<1x8x8xbf16> to vector<8x8xbf16>
    %77 = vector.shape_cast %74 : vector<8x8xbf16> to vector<1x8x8xbf16>
    tpu.vector_store %arg12[%c3_49, %c0_50, %c0_51], %77 {strides = array<i32>} : memref<4x8x8xbf16, #tpu.memory_space<vmem>>, vector<1x8x8xbf16>,
    return
  }
  func.func @transform_0(%arg0: i32) -> (i32, i32) {
    %c0_i32 = arith.constant 0 : i32
    %c0_i32_0 = arith.constant 0 : i32
    return %arg0, %c0_i32 : i32, i32
  }
  func.func @transform_1(%arg0: i32) -> (i32, i32) {
    %c0_i32 = arith.constant 0 : i32
    %c0_i32_0 = arith.constant 0 : i32
    return %arg0, %c0_i32 : i32, i32
  }
  func.func @transform_2(%arg0: i32) -> (i32, i32) {
    %c0_i32 = arith.constant 0 : i32
    %c0_i32_0 = arith.constant 0 : i32
    return %arg0, %c0_i32 : i32, i32
  }
  func.func @transform_3(%arg0: i32) -> (i32, i32) {
    %c0_i32 = arith.constant 0 : i32
    %c0_i32_0 = arith.constant 0 : i32
    %c0_i32_1 = arith.constant 0 : i32
    return %c0_i32, %c0_i32_0 : i32, i32
  }
  func.func @transform_4(%arg0: i32) -> (i32, i32) {
    %c0_i32 = arith.constant 0 : i32
    %c0_i32_0 = arith.constant 0 : i32
    %c0_i32_1 = arith.constant 0 : i32
    return %c0_i32, %c0_i32_0 : i32, i32
  }
  func.func @transform_5(%arg0: i32) -> (i32, i32) {
    %c0_i32 = arith.constant 0 : i32
    %c0_i32_0 = arith.constant 0 : i32
    %c0_i32_1 = arith.constant 0 : i32
    return %c0_i32, %c0_i32_0 : i32, i32
  }
  func.func @transform_6(%arg0: i32) -> (i32, i32) {
    %c0_i32 = arith.constant 0 : i32
    %c0_i32_0 = arith.constant 0 : i32
    %c0_i32_1 = arith.constant 0 : i32
    return %c0_i32, %c0_i32_0 : i32, i32
  }
  func.func @transform_7(%arg0: i32) -> (i32, i32) {
    %c0_i32 = arith.constant 0 : i32
    %c0_i32_0 = arith.constant 0 : i32
    %c0_i32_1 = arith.constant 0 : i32
    return %c0_i32, %c0_i32_0 : i32, i32
  }
  func.func @transform_8(%arg0: i32) -> (i32, i32) {
    %c0_i32 = arith.constant 0 : i32
    %c0_i32_0 = arith.constant 0 : i32
    %c0_i32_1 = arith.constant 0 : i32
    return %c0_i32, %c0_i32_0 : i32, i32
  }
  func.func @transform_9(%arg0: i32) -> (i32, i32, i32) {
    %c0_i32 = arith.constant 0 : i32
    %c0_i32_0 = arith.constant 0 : i32
    %c0_i32_1 = arith.constant 0 : i32
    return %c0_i32, %arg0, %c0_i32_0 : i32, i32, i32
  }
  func.func @transform_10(%arg0: i32) -> (i32, i32, i32) {
    %c0_i32 = arith.constant 0 : i32
    %c0_i32_0 = arith.constant 0 : i32
    %c0_i32_1 = arith.constant 0 : i32
    return %c0_i32, %arg0, %c0_i32_0 : i32, i32, i32
  }
  func.func @transform_11(%arg0: i32) -> (i32, i32, i32) {
    %c0_i32 = arith.constant 0 : i32
    %c0_i32_0 = arith.constant 0 : i32
    %c0_i32_1 = arith.constant 0 : i32
    return %c0_i32, %arg0, %c0_i32_0 : i32, i32, i32
  }
}

</mosaic_0001>

<bundles_post_ra>
// kernel: tpu_custom_call.1
= control target key start
LH: loop header
LB: loop body
LE: loop exit
PB: predicated region body
PF: predicated region fallthrough
CT: control target
= control target key end

     0   :  { %6 = vsyncpa [#allocation3], 0  ;;  %s124_s0 = inlined_call_operand.hbm [shape: f32[8,128], index: 0, kind: input, shape index: {}]   ;;  %s125_s1 = inlined_call_operand.hbm [shape: f32[8,128], index: 1, kind: output, shape index: {}]  }
   0x1   :  { %7 = vsyncpa [#allocation4], 0  ;;  %s88_s6 = smov [#allocation2]   ;;  %s40_s10 = scalar_lea.hbm %s124_s0, 128 }
   0x2   :  { %s14_s7 = sshll.u32 %s88_s6, 4  ;;  %p41_p0 = scmp.ne.s32.totalorder %s124_s0, %s40_s10  ;;  %s15_s7 = int_to_ptr.vmem [resolvable:$true] %s14_s7 }
   0x3   :  { %p44_p1 = scmp.lt.u32.totalorder %s40_s10, %s124_s0 }
   0x5   :  { %p46_p2 = pnand %p44_p1, %p41_p0 }
   0x7   :  { %49 = shalt.err (!%p46_p2)
}
   0x8   :  { %s50_s15 = scalar_lea.vmem %s15_s7, 128  ;;  %p55_p4 = scmp.lt.s32.totalorder %s15_s7, %s15_s7 }
   0x9   :  { %p51_p3 = scmp.ne.s32.totalorder %s15_s7, %s50_s15  ;;  %p56_p5 = scmp.lt.s32.totalorder %s50_s15, %s50_s15 }
   0xb   :  { %p57_p6 = por %p56_p5, %p55_p4 }
   0xd   :  { %p58_p7 = pnand %p57_p6, %p51_p3 }
   0xf   :  { %61 = shalt.err (!%p58_p7)
}
  0x10   :  { %17 = dma.hbm_to_vmem [thread:$0]  %s124_s0, 128, %s15_s7, [#allocation3]  }
  0x11   :  { %84 = dma.done.wait [#allocation3], 128  }
  0x12   :  { %85 = vsyncadd [#allocation3], 4294967168  ;;  %s89_s18 = smov [#allocation5]   ;;  %v21_v0 = vld [vmem:[#allocation2] sm:$0xff] }
  0x13   :  { %s29_s19 = sshll.u32 %s89_s18, 4  ;;  %22 = vst [vmem:[#allocation5] sm:$0xff] %v21_v0  ;;  %s30_s19 = int_to_ptr.vmem [resolvable:$true] %s29_s19 }
  0x14   :  { %s62_s20 = scalar_lea.vmem %s30_s19, 128  ;;  %p67_p9 = scmp.lt.s32.totalorder %s30_s19, %s30_s19 }
  0x15   :  { %p63_p8 = scmp.ne.s32.totalorder %s30_s19, %s62_s20  ;;  %p68_p10 = scmp.lt.s32.totalorder %s62_s20, %s62_s20 }
  0x17   :  { %p69_p11 = por %p68_p10, %p67_p9 }
  0x19   :  { %p70_p12 = pnand %p69_p11, %p63_p8 }
  0x1b   :  { %73 = shalt.err (!%p70_p12)
}
  0x1c   :  { %s74_s23 = scalar_lea.hbm %s125_s1, 128 }
  0x1d   :  { %p75_p13 = scmp.ne.s32.totalorder %s125_s1, %s74_s23  ;;  %p78_p0 = scmp.lt.u32.totalorder %s74_s23, %s125_s1 }
  0x1f   :  { %p80_p1 = pnand %p78_p0, %p75_p13 }
  0x21   :  { %83 = shalt.err (!%p80_p1)
}
  0x22   :  { %32 = dma.vmem_to_hbm [thread:$0]  %s30_s19, 128, %s125_s1, [#allocation4]  }
  0x23   :  { %86 = dma.done.wait [#allocation4], 128  }
  0x24   :  { %87 = vsyncadd [#allocation4], 4294967168 }
  0x25   :  { %36 = vsyncpa [#allocation3], 1 }
  0x26   :  { %37 = vsyncpa [#allocation4], 1 }

// kernel: tpu_custom_call.1
= control target key start
LH: loop header
LB: loop body
LE: loop exit
PB: predicated region body
PF: predicated region fallthrough
CT: control target
= control target key end

     0   :  { %17 = vsyncpa [#allocation3], 0  ;;  %s894_s0 = inlined_call_operand.hbm [shape: bf16[8,32], index: 0, kind: input, shape index: {}]   ;;  %s895_s1 = inlined_call_operand.hbm [shape: bf16[8,32], index: 1, kind: input, shape index: {}]   ;;  %s896_s2 = inlined_call_operand.hbm [shape: bf16[8,32], index: 2, kind: input, shape index: {}]   ;;  %s897_s3 = inlined_call_operand.hbm [shape: bf16[32,32], index: 3, kind: input, shape index: {}]   ;;  %s898_s4 = inlined_call_operand.vmem [shape: f32[1,32], index: 4, kind: input, shape index: {}]   ;;  %s899_s5 = inlined_call_operand.vmem [shape: bf16[32,32], index: 5, kind: input, shape index: {}]   ;;  %s900_s6 = inlined_call_operand.vmem [shape: f32[1,32], index: 6, kind: input, shape index: {}]   ;;  %s901_s7 = inlined_call_operand.hbm [shape: bf16[32,32], index: 7, kind: input, shape index: {}]   ;;  %s902_s8 = inlined_call_operand.vmem [shape: f32[1,32], index: 8, kind: input, shape index: {}]   ;;  %s903_s9 = inlined_call_operand.hbm [shape: bf16[4,8,8], index: 9, kind: output, shape index: {0}]   ;;  %s904_s10 = inlined_call_operand.hbm [shape: bf16[4,8,8], index: 10, kind: output, shape index: {1}]   ;;  %s905_s11 = inlined_call_operand.hbm [shape: bf16[4,8,8], index: 11, kind: output, shape index: {2}]  }
   0x1   :  { %18 = vsyncpa [#allocation6], 0 }
   0x2   :  { %19 = vsyncpa [#allocation9], 0 }
   0x3   :  { %20 = vsyncpa [#allocation4], 0 }
   0x4   :  { %21 = vsyncpa [#allocation13], 0  ;;  %s671_s17 = smov [#allocation5]   ;;  %s672_s19 = smov [#allocation8]  }
   0x5   :  { %s38_s18 = sshll.u32 %s671_s17, 4  ;;  %s57_s20 = sshll.u32 %s672_s19, 4  ;;  %s39_s18 = int_to_ptr.vmem [resolvable:$true] %s38_s18  ;;  %s746_s20 = int_to_ptr.vmem [resolvable:$true] %s57_s20 }
   0x6   :  { %s485_s23 = scalar_lea.hbm %s895_s1, 64 }
   0x7   :  { %p486_p0 = scmp.ne.s32.totalorder %s895_s1, %s485_s23  ;;  %p489_p1 = scmp.lt.u32.totalorder %s485_s23, %s895_s1 }
   0x9   :  { %p491_p2 = pnand %p489_p1, %p486_p0 }
   0xb   :  { %494 = shalt.err (!%p491_p2)
}
   0xc   :  { %s495_s28 = scalar_lea.vmem %s39_s18, 64  ;;  %p500_p4 = scmp.lt.s32.totalorder %s39_s18, %s39_s18 }
   0xd   :  { %p496_p3 = scmp.ne.s32.totalorder %s39_s18, %s495_s28  ;;  %p501_p5 = scmp.lt.s32.totalorder %s495_s28, %s495_s28 }
   0xf   :  { %p502_p6 = por %p501_p5, %p500_p4 }
  0x11   :  { %p503_p7 = pnand %p502_p6, %p496_p3 }
  0x13   :  { %506 = shalt.err (!%p503_p7)
}
  0x14   :  { %41 = dma.hbm_to_vmem [thread:$0]  %s895_s1, 64, %s39_s18, [#allocation6]  }
  0x15   :  { %s507_s14 = scalar_lea.hbm %s897_s3, 256 }
  0x16   :  { %p508_p8 = scmp.ne.s32.totalorder %s897_s3, %s507_s14  ;;  %p511_p9 = scmp.lt.u32.totalorder %s507_s14, %s897_s3 }
  0x18   :  { %p513_p10 = pnand %p511_p9, %p508_p8 }
  0x1a   :  { %516 = shalt.err (!%p513_p10)
}
  0x1b   :  { %s517_s21 = scalar_lea.vmem %s746_s20, 256  ;;  %p522_p12 = scmp.lt.s32.totalorder %s746_s20, %s746_s20 }
  0x1c   :  { %p518_p11 = scmp.ne.s32.totalorder %s746_s20, %s517_s21  ;;  %p523_p13 = scmp.lt.s32.totalorder %s517_s21, %s517_s21 }
  0x1e   :  { %p524_p0 = por %p523_p13, %p522_p12 }
  0x20   :  { %p525_p1 = pnand %p524_p0, %p518_p11 }
  0x22   :  { %528 = shalt.err (!%p525_p1)
}
  0x23   :  { %s673_s1 = smov 64   ;;  %s674_s18 = smov 4  }
  0x24   :  { %63 = dma.hbm_to_vmem [thread:$0]  %s897_s3, 256, %s746_s20, [#allocation9], %s673_s1, %s673_s1, %s674_s18  }
  0x25   :  { %s675_s24 = smov [#allocation2]   ;;  %s676_s26 = smov [#allocation7]  }
  0x26   :  { %s28_s25 = sshll.u32 %s675_s24, 4  ;;  %s48_s27 = sshll.u32 %s676_s26, 4  ;;  %s29_s25 = int_to_ptr.vmem [resolvable:$true] %s28_s25  ;;  %s49_s27 = int_to_ptr.vmem [resolvable:$true] %s48_s27 }
  0x27   :  { %s529_s30 = scalar_lea.hbm %s894_s0, 64 }
  0x28   :  { %p530_p2 = scmp.ne.s32.totalorder %s894_s0, %s529_s30  ;;  %p533_p3 = scmp.lt.u32.totalorder %s529_s30, %s894_s0 }
  0x2a   :  { %p535_p4 = pnand %p533_p3, %p530_p2 }
  0x2c   :  { %538 = shalt.err (!%p535_p4)
}
  0x2d   :  { %s539_s3 = scalar_lea.vmem %s29_s25, 64  ;;  %p544_p6 = scmp.lt.s32.totalorder %s29_s25, %s29_s25 }
  0x2e   :  { %p540_p5 = scmp.ne.s32.totalorder %s29_s25, %s539_s3  ;;  %p545_p7 = scmp.lt.s32.totalorder %s539_s3, %s539_s3 }
  0x30   :  { %p546_p8 = por %p545_p7, %p544_p6 }
  0x32   :  { %p547_p9 = pnand %p546_p8, %p540_p5 }
  0x34   :  { %550 = shalt.err (!%p547_p9)
}
  0x35   :  { %31 = dma.hbm_to_vmem [thread:$0]  %s894_s0, 64, %s29_s25, [#allocation3]  }
  0x36   :  { %s551_s21 = scalar_lea.hbm %s896_s2, 64 }
  0x37   :  { %p552_p10 = scmp.ne.s32.totalorder %s896_s2, %s551_s21  ;;  %p555_p11 = scmp.lt.u32.totalorder %s551_s21, %s896_s2 }
  0x39   :  { %p557_p12 = pnand %p555_p11, %p552_p10 }
  0x3b   :  { %560 = shalt.err (!%p557_p12)
}
  0x3c   :  { %s561_s28 = scalar_lea.vmem %s49_s27, 64  ;;  %p566_p0 = scmp.lt.s32.totalorder %s49_s27, %s49_s27 }
  0x3d   :  { %p562_p13 = scmp.ne.s32.totalorder %s49_s27, %s561_s28  ;;  %p567_p1 = scmp.lt.s32.totalorder %s561_s28, %s561_s28 }
  0x3f   :  { %p568_p2 = por %p567_p1, %p566_p0 }
  0x41   :  { %p569_p3 = pnand %p568_p2, %p562_p13 }
  0x43   :  { %572 = shalt.err (!%p569_p3)
}
  0x44   :  { %51 = dma.hbm_to_vmem [thread:$0]  %s896_s2, 64, %s49_s27, [#allocation6]  }
  0x45   :  { %s677_s29 = smov [#allocation10]   ;;  %s573_s14 = scalar_lea.hbm %s901_s7, 256 }
  0x46   :  { %s75_s30 = sshll.u32 %s677_s29, 4  ;;  %p574_p4 = scmp.ne.s32.totalorder %s901_s7, %s573_s14  ;;  %s76_s30 = int_to_ptr.vmem [resolvable:$true] %s75_s30 }
  0x47   :  { %p577_p5 = scmp.lt.u32.totalorder %s573_s14, %s901_s7 }
  0x49   :  { %p579_p6 = pnand %p577_p5, %p574_p4 }
  0x4b   :  { %582 = shalt.err (!%p579_p6)
}
  0x4c   :  { %s583_s17 = scalar_lea.vmem %s76_s30, 256  ;;  %p588_p8 = scmp.lt.s32.totalorder %s76_s30, %s76_s30 }
  0x4d   :  { %p584_p7 = scmp.ne.s32.totalorder %s76_s30, %s583_s17  ;;  %p589_p9 = scmp.lt.s32.totalorder %s583_s17, %s583_s17 }
  0x4f   :  { %p590_p10 = por %p589_p9, %p588_p8 }
  0x51   :  { %p591_p11 = pnand %p590_p10, %p584_p7 }
  0x53   :  { %594 = shalt.err (!%p591_p11)
}
  0x54   :  { %81 = dma.hbm_to_vmem [thread:$0]  %s901_s7, 256, %s76_s30, [#allocation9], %s673_s1, %s673_s1, %s674_s18  }
  0x55   :  { %661 = dma.done.wait [#allocation3], 64  }
  0x56   :  { %662 = vsyncadd [#allocation3], 4294967232 }
  0x57   :  { %663 = dma.done.wait [#allocation6], 128  }
  0x58   :  { %664 = vsyncadd [#allocation6], 4294967168 }
  0x59   :  { %665 = dma.done.wait [#allocation9], 512  }
  0x5a   :  { %666 = vsyncadd [#allocation9], 4294966784  ;;  %v678_v0 = vmov 0.0   ;;  %vm679_vm0 = vmmov 0   ;;  %v479_v1 = vld [vmem:[%s899_s5] sm:$0xff]   ;;  %v481_v3 = vld [vmem:[%s899_s5 + $0x8] sm:$0xff]  }
  0x5b   :  { %448 = vmatprep.subr.bf16.mxu1 %v678_v0  ;;  %440 = vmatprep.subr.bf16.mxu0 %v678_v0  ;;  %v480_v2 = vld [vmem:[#allocation8] sm:$0xff]   ;;  %v482_v4 = vld [vmem:[#allocation8 + $0x8] sm:$0xff]   ;;  %vm124_vm1 = vcmask 261120   ;;  %v189_v5 = vld [vmem:[#allocation5] sm:$0xf]  ;;  %vm169_vm2 = vcmask 60416  }
  0x5c   :  { %452 = vmatprep.mubr.msk.bf16.mxu1 %vm679_vm0, %v678_v0  ;;  %444 = vmatprep.mubr.msk.bf16.mxu0 %vm679_vm0, %v678_v0  ;;  %v100_v6 = vld [vmem:[#allocation2] sm:$0xf]  ;;  %v484_v8 = vld [vmem:[#allocation10 + $0x8] sm:$0xff]   ;;  %v418_v10 = vld [vmem:[%s900_s6] ss:$0 sm:$0xff]  ;;  %s680_s28 = smov 104  }
  0x5d   :  { %449 = vmatpush3.bf16.msra.mxu1 %v479_v1  ;;  %441 = vmatpush3.bf16.msra.mxu0 %v480_v2  ;;  %v483_v7 = vld [vmem:[#allocation10] sm:$0xff]   ;;  %v276_v9 = vld [vmem:[#allocation7] sm:$0xf]  ;;  %v413_v11 = vld [vmem:[%s898_s4] ss:$0 sm:$0xff]  ;;  %s681_s6 = smov 120  }
  0x5e   :  { %450 = vmatprep.subr.bf16.mxu1 %v678_v0  ;;  %442 = vmatprep.subr.bf16.mxu0 %v678_v0  ;;  %v423_v24 = vld [vmem:[%s902_s8] ss:$0 sm:$0xff]  ;;  %s682_s25 = smov 112   ;;  %s683_s29 = smov [#allocation12]  }
  0x5f   :  { %s380_s8 = sshll.u32 %s683_s29, 4  ;;  %s684_s30 = smov [#allocation11]   ;;  %s381_s8 = int_to_ptr.vmem [resolvable:$true] %s380_s8 }
  0x60   :  { %s368_s12 = sshll.u32 %s684_s30, 4  ;;  %s595_s13 = scalar_lea.vmem %s381_s8, 256  ;;  %s369_s12 = int_to_ptr.vmem [resolvable:$true] %s368_s12 }
  0x61   :  { %451 = vmatpush3.bf16.msra.mxu1 %v481_v3  ;;  %443 = vmatpush3.bf16.msra.mxu0 %v482_v4  ;;  %p596_p12 = scmp.ne.s32.totalorder %s381_s8, %s595_s13  ;;  %p600_p13 = scmp.lt.s32.totalorder %s381_s8, %s381_s8 }
  0x62   :  { %456 = vmatprep.subr.bf16.mxu0 %v678_v0  ;;  %p601_p0 = scmp.lt.s32.totalorder %s595_s13, %s595_s13 }
  0x64   :  { %453 = vmatmul.mubr.msk.bf16.vlgmr.msra.gmra.mrb[0].mxu1 %vm124_vm1, %v189_v5  ;;  %445 = vmatmul.mubr.msk.bf16.vlgmr.msra.gmra.mrb[0].mxu0 %vm124_vm1, %v100_v6  ;;  %p602_p1 = por %p601_p0, %p600_p13 }
  0x65   :  { %457 = vmatpush3.bf16.msra.mxu0 %v483_v7  ;;  %460 = vmatprep.mubr.msk.bf16.mxu0 %vm679_vm0, %v678_v0 }
  0x66   :  { %458 = vmatprep.subr.bf16.mxu0 %v678_v0  ;;  %p603_p2 = pnand %p602_p1, %p596_p12 }
  0x69   :  { %459 = vmatpush3.bf16.msra.mxu0 %v484_v8 }
  0x6c   :  { %461 = vmatmul.mubr.msk.bf16.vlgmr.msra.gmra.mrb[4].mxu0 %vm124_vm1, %v276_v9 }
 0x137   :  { %v250_v12 = vpop.f32.mrb[0].mxu1  ;;  %v162_v14 = vpop.f32.mrb[0].mxu0 }
 0x138   :  { %v251_v13 = vadd.f32 %v418_v10, %v250_v12  ;;  %v454_v15 = vpop.f32.mrb[1].mxu1  ;;  %v163_v16 = vadd.f32 %v413_v11, %v162_v14  ;;  %v446_v17 = vpop.f32.mrb[1].mxu0 }
 0x139   :  { %v253_v18 = vpop.f32.mrb[2].mxu1  ;;  %v165_v20 = vpop.f32.mrb[2].mxu0 }
 0x13a   :  { %v256_v19 = vpack.c.bf16 %v251_v13, %v251_v13  ;;  %v455_v21 = vpop.f32.mrb[3].mxu1  ;;  %v168_v22 = vpack.c.bf16 %v163_v16, %v163_v16  ;;  %v447_v23 = vpop.f32.mrb[3].mxu0 }
 0x13c   :  { %271 = vrot.lane.b32.xlu1 %v256_v19, %s680_s28  ;;  %261 = vrot.lane.b32.xlu0 %v256_v19, %s681_s6  ;;  %257 = vst.msk [vmem:[#allocation12] sm:$0xf] %vm169_vm2, %v256_v19  ;;  %170 = vst.msk [vmem:[#allocation11] sm:$0xf] %vm169_vm2, %v168_v22 }
 0x13f   :  { %v337_v25 = vpop.f32.mrb[4].mxu0 }
 0x140   :  { %266 = vrot.lane.b32.xlu0 %v256_v19, %s682_s25  ;;  %174 = vrot.lane.b32.xlu1 %v168_v22, %s681_s6  ;;  %v338_v26 = vadd.f32 %v423_v24, %v337_v25  ;;  %v462_v27 = vpop.f32.mrb[5].mxu0 }
 0x141   :  { %v340_v28 = vpop.f32.mrb[6].mxu0 }
 0x142   :  { %v343_v29 = vpack.c.bf16 %v338_v26, %v338_v26  ;;  %v463_v30 = vpop.f32.mrb[7].mxu0 }
 0x144   :  { %179 = vrot.lane.b32.xlu0 %v168_v22, %s682_s25  ;;  %184 = vrot.lane.b32.xlu1 %v168_v22, %s680_s28  ;;  %344 = vst.msk [vmem:[#allocation14] sm:$0xf] %vm169_vm2, %v343_v29 }
 0x148   :  { %353 = vrot.lane.b32.xlu1 %v343_v29, %s682_s25  ;;  %348 = vrot.lane.b32.xlu0 %v343_v29, %s681_s6 }
 0x14c   :  { %358 = vrot.lane.b32.xlu0 %v343_v29, %s680_s28 }
 0x1ae   :  { %v272_v31 = vpop.permute.xlu1 %271  ;;  %v262_v32 = vpop.permute.xlu0 %261 }
 0x1af   :  { %275 = vst.msk [vmem:[#allocation12 + $0xc] sm:$0xf] %vm169_vm2, %v272_v31  ;;  %265 = vst.msk [vmem:[#allocation12 + $0x4] sm:$0xf] %vm169_vm2, %v262_v32 }
 0x1b2   :  { %v267_v33 = vpop.permute.xlu0 %266  ;;  %v175_v34 = vpop.permute.xlu1 %174 }
 0x1b3   :  { %270 = vst.msk [vmem:[#allocation12 + $0x8] sm:$0xf] %vm169_vm2, %v267_v33  ;;  %178 = vst.msk [vmem:[#allocation11 + $0x4] sm:$0xf] %vm169_vm2, %v175_v34 }
 0x1b4   :  { %606 = shalt.err (!%p603_p2)
}
 0x1b5   :  { %s607_s3 = scalar_lea.hbm %s904_s10, 256 }
 0x1b6   :  { %p608_p3 = scmp.ne.s32.totalorder %s904_s10, %s607_s3  ;;  %p611_p4 = scmp.lt.u32.totalorder %s607_s3, %s904_s10 }
 0x1b8   :  { %p613_p5 = pnand %p611_p4, %p608_p3 }
 0x1ba   :  { %616 = shalt.err (!%p613_p5)
}
 0x1bb   :  { %386 = dma.vmem_to_hbm [thread:$0]  %s381_s8, 256, %s904_s10, [#allocation13], %s673_s1, %s673_s1, %s674_s18   ;;  %v180_v35 = vpop.permute.xlu0 %179  ;;  %v185_v36 = vpop.permute.xlu1 %184 }
 0x1bc   :  { %183 = vst.msk [vmem:[#allocation11 + $0x8] sm:$0xf] %vm169_vm2, %v180_v35  ;;  %188 = vst.msk [vmem:[#allocation11 + $0xc] sm:$0xf] %vm169_vm2, %v185_v36  ;;  %s617_s21 = scalar_lea.vmem %s369_s12, 256  ;;  %p622_p7 = scmp.lt.s32.totalorder %s369_s12, %s369_s12 }
 0x1bd   :  { %p618_p6 = scmp.ne.s32.totalorder %s369_s12, %s617_s21  ;;  %p623_p8 = scmp.lt.s32.totalorder %s617_s21, %s617_s21 }
 0x1bf   :  { %p624_p9 = por %p623_p8, %p622_p7 }
 0x1c1   :  { %p625_p10 = pnand %p624_p9, %p618_p6 }
 0x1c3   :  { %628 = shalt.err (!%p625_p10)
}
 0x1c4   :  { %s629_s5 = scalar_lea.hbm %s903_s9, 256 }
 0x1c5   :  { %p630_p11 = scmp.ne.s32.totalorder %s903_s9, %s629_s5  ;;  %p633_p12 = scmp.lt.u32.totalorder %s629_s5, %s903_s9 }
 0x1c7   :  { %p635_p13 = pnand %p633_p12, %p630_p11 }
 0x1c9   :  { %638 = shalt.err (!%p635_p13)
}
 0x1ca   :  { %374 = dma.vmem_to_hbm [thread:$0]  %s369_s12, 256, %s903_s9, [#allocation4], %s673_s1, %s673_s1, %s674_s18   ;;  %v354_v37 = vpop.permute.xlu1 %353  ;;  %v349_v38 = vpop.permute.xlu0 %348 }
 0x1cb   :  { %s685_s4 = smov [#allocation14]   ;;  %357 = vst.msk [vmem:[#allocation14 + $0x8] sm:$0xf] %vm169_vm2, %v354_v37  ;;  %352 = vst.msk [vmem:[#allocation14 + $0x4] sm:$0xf] %vm169_vm2, %v349_v38 }
 0x1cc   :  { %s392_s0 = sshll.u32 %s685_s4, 4  ;;  %s393_s0 = int_to_ptr.vmem [resolvable:$true] %s392_s0 }
 0x1cd   :  { %s639_s25 = scalar_lea.vmem %s393_s0, 256  ;;  %p644_p1 = scmp.lt.s32.totalorder %s393_s0, %s393_s0 }
 0x1ce   :  { %v359_v39 = vpop.permute.xlu0 %358  ;;  %p640_p0 = scmp.ne.s32.totalorder %s393_s0, %s639_s25  ;;  %p645_p2 = scmp.lt.s32.totalorder %s639_s25, %s639_s25 }
 0x1cf   :  { %362 = vst.msk [vmem:[#allocation14 + $0xc] sm:$0xf] %vm169_vm2, %v359_v39 }
 0x1d0   :  { %p646_p3 = por %p645_p2, %p644_p1 }
 0x1d2   :  { %p647_p4 = pnand %p646_p3, %p640_p0 }
 0x1d4   :  { %650 = shalt.err (!%p647_p4)
}
 0x1d5   :  { %s651_s8 = scalar_lea.hbm %s905_s11, 256 }
 0x1d6   :  { %p652_p5 = scmp.ne.s32.totalorder %s905_s11, %s651_s8  ;;  %p655_p6 = scmp.lt.u32.totalorder %s651_s8, %s905_s11 }
 0x1d8   :  { %p657_p7 = pnand %p655_p6, %p652_p5 }
 0x1da   :  { %660 = shalt.err (!%p657_p7)
}
 0x1db   :  { %398 = dma.vmem_to_hbm [thread:$0]  %s393_s0, 256, %s905_s11, [#allocation13], %s673_s1, %s673_s1, %s674_s18  }
 0x1dc   :  { %667 = dma.done.wait [#allocation4], 256  }
 0x1dd   :  { %668 = vsyncadd [#allocation4], 4294967040 }
 0x1de   :  { %669 = dma.done.wait [#allocation13], 512  }
 0x1df   :  { %670 = vsyncadd [#allocation13], 4294966784 }
 0x1e0   :  { %408 = vsyncpa [#allocation3], 1 }
 0x1e1   :  { %409 = vsyncpa [#allocation6], 1 }
 0x1e2   :  { %410 = vsyncpa [#allocation9], 1 }
 0x1e3   :  { %411 = vsyncpa [#allocation4], 1 }
 0x1e4   :  { %412 = vsyncpa [#allocation13], 1 }

</bundles_post_ra>
